<compile_context>
chip_gen: v7x
topology: tpu7x:2x2x1
jax: 0.10.0
libtpu: 0.0.40
codegen_flags: <defaults>
</compile_context>

<pallas_src>
import functools

import jax
import jax.numpy as jnp
from jax.experimental import pallas as pl
from jax.experimental.pallas import tpu as pltpu


def _round_up(x, n):
    return (x + n - 1) // n * n


def _num_tensorcores():
    """Best-effort TensorCore count (megacore gating is perf-only)."""
    try:
        kind = jax.devices()[0].device_kind.lower()
    except Exception:
        return 1
    return 2 if any(tag in kind for tag in ("v4", "v5p", "v7", "7x")) else 1


def _vmem_capacity_bytes():
    try:
        return int(pltpu.get_tpu_info().vmem_capacity_bytes)
    except Exception:
        return 128 << 20  # v5e/v6e default


def _mcr2_gram_kernel(x_ref, pm_ref, out_ref, rhs_ref, *,
                      num_groups, p_pad, compute_dtype):
    """Accumulate all masked Gram matrices for one m-tile with ONE wide matmul.

    x_ref   : VMEM (block_m, p_pad)          f32 or compute dtype
    pm_ref  : VMEM (block_m, G)              f32 per-class membership masks
    out_ref : VMEM (1, p_pad, G*p_pad)       f32 accumulator, resident across the
                                             'arbitrary' m-tile axis
    rhs_ref : VMEM (block_m, G*p_pad)        compute-dtype scratch for the
                                             concatenated masked RHS
    """
    t = pl.program_id(1)

    @pl.when(t == 0)
    def _init():
        out_ref[...] = jnp.zeros_like(out_ref)

    xc = x_ref[...].astype(compute_dtype)           # (block_m, p_pad)
    pmc = pm_ref[...].astype(compute_dtype)         # (block_m, G)

    # Build RHS_cat = [x*pi_0 | x*pi_1 | ...] with 128-aligned slab stores.
    # TODO(synk): for G > ~32 switch to a lax.fori_loop with pl.ds slab offsets.
    for k in range(num_groups):
        rhs_ref[:, k * p_pad:(k + 1) * p_pad] = xc * pmc[:, k:k + 1]

    # One wide MXU matmul: x^T @ RHS_cat -> (p_pad, G*p_pad), f32 accumulation.
    # x is the (single) transposed operand -> one transpose per tile, not per class.
    out_ref[0] += jax.lax.dot_general(
        xc, rhs_ref[...], (((0,), (0,)), ((), ())),
        preferred_element_type=jnp.float32)


def mcr2_forward(X, Y, eps=0.01, gamma=1.0, num_classes=None,
                 block_m=1024, compute_dtype=jnp.bfloat16):
    """Replicates MaximalCodingRateReduction.forward.

    Returns (total_loss, (discrimn_loss, compress_loss)) as JAX scalars.
    compute_dtype: MXU input dtype (bf16 default; jnp.float32 for exact parity).
    """
    X = jnp.asarray(X, jnp.float32)
    m, p = X.shape

    hard_labels = (Y.ndim == 1)
    if hard_labels:
        if num_classes is None:
            try:
                num_classes = int(jnp.max(Y)) + 1
            except jax.errors.ConcretizationTypeError as e:
                raise ValueError(
                    "num_classes must be provided when Y is traced (jit).") from e
        K = int(num_classes)
        # Assumes labels lie in [0, K) (same contract as the torch module, which
        # would index-error otherwise); one-hot rows then sum to 1, so
        # X^T X = sum_k S_k and no extra all-ones mask is needed.
        Pi = jax.nn.one_hot(Y, K, dtype=jnp.float32)          # (m, K)
        masks = Pi
        G = K
    else:
        Pi = jnp.asarray(Y, jnp.float32)                      # (m, K) soft memberships
        K = Pi.shape[1] if num_classes is None else int(num_classes)
        Pi = Pi[:, :K]
        # Soft labels may not sum to 1 per row -> explicit all-ones mask for X^T X.
        masks = jnp.concatenate([Pi, jnp.ones((m, 1), jnp.float32)], axis=1)
        G = K + 1

    trPi = Pi.sum(axis=0) + 1e-8                              # (K,)

    cdt = jnp.dtype(compute_dtype)
    sub = max(8, 32 // max(1, cdt.itemsize))                  # sublane tile: 8 f32, 16 bf16
    p_pad = _round_up(p, 128)                                 # lane-dense feature dim
    gp = G * p_pad

    # ---- generation-aware VMEM budget (128 MiB v5e/v6e, 64 MiB v7x) ----
    budget = int(0.78 * _vmem_capacity_bytes())

    def _est_vmem(bm):
        return (2 * bm * p_pad * 4                            # X tile (f32 worst case), 2 bufs
                + 2 * bm * _round_up(G, 128) * 4              # mask tile (lane-padded), 2 bufs
                + bm * gp * cdt.itemsize                      # RHS_cat scratch
                + bm * p_pad * cdt.itemsize                   # casted LHS value
                + 2 * p_pad * gp * 4)                         # resident f32 accumulator

    block_m = _round_up(max(sub, min(block_m, _round_up(m, sub))), sub)
    while _est_vmem(block_m) > budget and block_m > sub:
        block_m = max(sub, _round_up(block_m // 2, sub))
    # TODO(synk): if even block_m == sub exceeds the budget (huge K*p_pad^2 accumulator,
    # e.g. v7x 64 MiB), add an output-tiling grid axis over class panels and re-stream X.

    num_tiles = _round_up(m, block_m) // block_m
    if _num_tensorcores() >= 2 and num_tiles >= 2:
        num_tiles = _round_up(num_tiles, 2)                   # extra tile (if any) is all-zero
        num_splits = 2
    else:
        num_splits = 1                                        # single TC: split is pure overhead
    tiles_per_split = num_tiles // num_splits
    m_pad = num_tiles * block_m

    # ---- stage inputs (exact: zero-padded rows/cols contribute nothing) ----
    needs_pad = (m_pad != m) or (p_pad != p)
    if needs_pad:
        # Fuse pad + cast into one XLA op (cheaper than pad-f32 then kernel-read-f32).
        Xk = jnp.pad(X, ((0, m_pad - m), (0, p_pad - p))).astype(cdt)
    else:
        # TODO(synk): CompilerParams(allow_input_fusion=...) could fuse a producer
        # pad/cast directly into the pallas_call input when padding IS needed.
        Xk = X                                                # f32, cast in-kernel (VPU)
    Mp = jnp.pad(masks, ((0, m_pad - m), (0, 0)))             # f32, tiny

    vmem_limit = int(min(max(_est_vmem(block_m) + (8 << 20), 32 << 20), budget))

    kernel = functools.partial(_mcr2_gram_kernel,
                               num_groups=G, p_pad=p_pad, compute_dtype=cdt)

    grams_wide = pl.pallas_call(
        kernel,
        out_shape=jax.ShapeDtypeStruct((num_splits, p_pad, gp), jnp.float32),
        grid=(num_splits, tiles_per_split),
        in_specs=[
            pl.BlockSpec((block_m, p_pad),
                         lambda c, t: (c * tiles_per_split + t, 0)),
            pl.BlockSpec((block_m, G),
                         lambda c, t: (c * tiles_per_split + t, 0)),
        ],
        out_specs=pl.BlockSpec((1, p_pad, gp), lambda c, t: (c, 0, 0)),
        scratch_shapes=[pltpu.VMEM((block_m, gp), cdt)],
        compiler_params=pltpu.CompilerParams(
            dimension_semantics=("parallel", "arbitrary"),
            vmem_limit_bytes=vmem_limit),
    )(Xk, Mp)

    # Sum partial Grams from the core-split axis, unfold classes, drop feature padding.
    wide = grams_wide.sum(axis=0) if num_splits > 1 else grams_wide[0]   # (p_pad, G*p_pad)
    S = wide.reshape(p_pad, G, p_pad).transpose(1, 0, 2)[:, :p, :p]      # (G, p, p)

    if hard_labels:
        S_classes = S                                         # (K, p, p)
        S_total = jnp.sum(S, axis=0)                          # == X^T X (one-hot rows sum to 1)
    else:
        S_classes = S[:K]
        S_total = S[K]

    eye = jnp.eye(p, dtype=jnp.float32)
    # TODO(synk): logdet (matrix factorization) has no Pallas primitive; plain JAX here.
    logdet_d = jnp.linalg.slogdet(eye + (p / (m * eps)) * S_total)[1]
    scale_c = (p / (trPi * eps)).astype(jnp.float32)[:, None, None]
    logdet_c = jnp.linalg.slogdet(eye[None] + scale_c * S_classes)[1]

    discrimn_loss = logdet_d / 2.0
    compress_loss = jnp.sum(trPi * logdet_c / (2.0 * m))
    total_loss = -discrimn_loss + gamma * compress_loss
    return total_loss, (discrimn_loss, compress_loss)


def _mcr2_reference(X, Y, eps, gamma, num_classes):
    """Plain-JAX float32 reference (mirrors the PyTorch module)."""
    X = X.astype(jnp.float32)
    m, p = X.shape
    Pi = jax.nn.one_hot(Y, num_classes, dtype=jnp.float32)    # (m, K)
    eye = jnp.eye(p, dtype=jnp.float32)
    discrimn = jnp.linalg.slogdet(eye + (p / (m * eps)) * (X.T @ X))[1] / 2.0
    trPi = Pi.sum(0) + 1e-8
    grams_k = jnp.einsum('mp,mk,mq->kpq', X, Pi, X)
    scale = (p / (trPi * eps))[:, None, None]
    logdet_k = jnp.linalg.slogdet(eye[None] + scale * grams_k)[1]
    compress = jnp.sum(trPi * logdet_k / (2.0 * m))
    return -discrimn + gamma * compress, (discrimn, compress)


if __name__ == "__main__":
    key = jax.random.PRNGKey(0)
    kx, ky = jax.random.split(key)

    m, p, K = 64, 32, 4                      # samples, feature dim, classes
    X = jax.random.normal(kx, (m, p), dtype=jnp.float32)
    Y = jax.random.randint(ky, (m,), 0, K)

    total_loss, (discrimn_loss, compress_loss) = mcr2_forward(
        X, Y, eps=0.01, gamma=1.0, num_classes=K)
    jax.block_until_ready(total_loss)
    jax.block_until_ready(discrimn_loss)
    jax.block_until_ready(compress_loss)

    # Sanity check vs. plain-JAX f32 reference (loose tol: kernel uses bf16 MXU inputs).
    ref_total, (ref_d, ref_c) = _mcr2_reference(X, Y, 0.01, 1.0, K)
    assert jnp.allclose(total_loss, ref_total, rtol=5e-2, atol=5e-2), (total_loss, ref_total)
    assert jnp.allclose(discrimn_loss, ref_d, rtol=5e-2, atol=5e-2), (discrimn_loss, ref_d)
    assert jnp.allclose(compress_loss, ref_c, rtol=5e-2, atol=5e-2), (compress_loss, ref_c)

    print("KERNEL_OK")
</pallas_src>

<mosaic_0001>
module attributes {stable_mosaic.version = 11 : i64} {
  func.func @_mcr2_gram_kernel(%arg0: i32, %arg1: i32, %arg2: memref<64x128xbf16, #tpu.memory_space<vmem>>, %arg3: memref<64x4xf32, #tpu.memory_space<vmem>>, %arg4: memref<1x128x512xf32, #tpu.memory_space<vmem>>, %arg5: memref<64x512xbf16, #tpu.memory_space<vmem>>) attributes {dimension_semantics = [#tpu.dimension_semantics<parallel>, #tpu.dimension_semantics<arbitrary>], iteration_bounds = array<i64: 1, 1>, scalar_prefetch = 0 : i64, scratch_operands = 1 : i64, tpu.core_type = #tpu.core_type<tc>, window_params = [{transform_indices = @transform_0, window_bounds = array<i64: 64, 128>}, {transform_indices = @transform_1, window_bounds = array<i64: 64, 4>}, {transform_indices = @transform_2, window_bounds = array<i64: 1, 128, 512>}]} {
    %c0_i32 = arith.constant 0 : i32
    %0 = arith.cmpi eq, %arg1, %c0_i32 : i32
    %1 = arith.extui %0 : i1 to i32
    %c0_i32_0 = arith.constant 0 : i32
    %2 = arith.cmpi ne, %1, %c0_i32_0 : i32
    scf.if %2 {
      %cst_17 = arith.constant 0.000000e+00 : f32
      %30 = vector.broadcast %cst_17 : f32 to vector<1x128x512xf32>
      %c0_18 = arith.constant 0 : index
      %c0_19 = arith.constant 0 : index
      %c0_20 = arith.constant 0 : index
      %31 = vector.load %arg4[%c0_18, %c0_19, %c0_20] : memref<1x128x512xf32, #tpu.memory_space<vmem>>, vector<1x128x512xf32>
      tpu.vector_store %arg4[%c0_18, %c0_19, %c0_20], %30 {strides = array<i32>} : memref<1x128x512xf32, #tpu.memory_space<vmem>>, vector<1x128x512xf32>,
    } else {
    }
    %c0 = arith.constant 0 : index
    %c0_1 = arith.constant 0 : index
    %3 = vector.load %arg2[%c0, %c0_1] : memref<64x128xbf16, #tpu.memory_space<vmem>>, vector<64x128xbf16>
    %c0_2 = arith.constant 0 : index
    %c0_3 = arith.constant 0 : index
    %4 = vector.load %arg3[%c0_2, %c0_3] : memref<64x4xf32, #tpu.memory_space<vmem>>, vector<64x4xf32>
    %5 = arith.truncf %4 : vector<64x4xf32> to vector<64x4xbf16>
    %6 = vector.extract_strided_slice %5 {offsets = [0, 0], sizes = [64, 1], strides = [1, 1]} : vector<64x4xbf16> to vector<64x1xbf16>
    %7 = vector.broadcast %6 : vector<64x1xbf16> to vector<64x128xbf16>
    %8 = arith.mulf %3, %7 : vector<64x128xbf16>
    %c0_4 = arith.constant 0 : index
    %c0_5 = arith.constant 0 : index
    %9 = vector.load %arg5[%c0_4, %c0_5] : memref<64x512xbf16, #tpu.memory_space<vmem>>, vector<64x128xbf16>
    tpu.vector_store %arg5[%c0_4, %c0_5], %8 {strides = array<i32>} : memref<64x512xbf16, #tpu.memory_space<vmem>>, vector<64x128xbf16>,
    %10 = vector.extract_strided_slice %5 {offsets = [0, 1], sizes = [64, 1], strides = [1, 1]} : vector<64x4xbf16> to vector<64x1xbf16>
    %11 = vector.broadcast %10 : vector<64x1xbf16> to vector<64x128xbf16>
    %12 = arith.mulf %3, %11 : vector<64x128xbf16>
    %c0_6 = arith.constant 0 : index
    %c128 = arith.constant 128 : index
    %13 = vector.load %arg5[%c0_6, %c128] : memref<64x512xbf16, #tpu.memory_space<vmem>>, vector<64x128xbf16>
    tpu.vector_store %arg5[%c0_6, %c128], %12 {strides = array<i32>} : memref<64x512xbf16, #tpu.memory_space<vmem>>, vector<64x128xbf16>,
    %14 = vector.extract_strided_slice %5 {offsets = [0, 2], sizes = [64, 1], strides = [1, 1]} : vector<64x4xbf16> to vector<64x1xbf16>
    %15 = vector.broadcast %14 : vector<64x1xbf16> to vector<64x128xbf16>
    %16 = arith.mulf %3, %15 : vector<64x128xbf16>
    %c0_7 = arith.constant 0 : index
    %c256 = arith.constant 256 : index
    %17 = vector.load %arg5[%c0_7, %c256] : memref<64x512xbf16, #tpu.memory_space<vmem>>, vector<64x128xbf16>
    tpu.vector_store %arg5[%c0_7, %c256], %16 {strides = array<i32>} : memref<64x512xbf16, #tpu.memory_space<vmem>>, vector<64x128xbf16>,
    %18 = vector.extract_strided_slice %5 {offsets = [0, 3], sizes = [64, 1], strides = [1, 1]} : vector<64x4xbf16> to vector<64x1xbf16>
    %19 = vector.broadcast %18 : vector<64x1xbf16> to vector<64x128xbf16>
    %20 = arith.mulf %3, %19 : vector<64x128xbf16>
    %c0_8 = arith.constant 0 : index
    %c384 = arith.constant 384 : index
    %21 = vector.load %arg5[%c0_8, %c384] : memref<64x512xbf16, #tpu.memory_space<vmem>>, vector<64x128xbf16>
    tpu.vector_store %arg5[%c0_8, %c384], %20 {strides = array<i32>} : memref<64x512xbf16, #tpu.memory_space<vmem>>, vector<64x128xbf16>,
    %c0_9 = arith.constant 0 : index
    %c0_10 = arith.constant 0 : index
    %c0_11 = arith.constant 0 : index
    %22 = vector.load %arg4[%c0_9, %c0_10, %c0_11] : memref<1x128x512xf32, #tpu.memory_space<vmem>>, vector<1x128x512xf32>
    %23 = vector.shape_cast %22 : vector<1x128x512xf32> to vector<128x512xf32>
    %c0_12 = arith.constant 0 : index
    %c0_13 = arith.constant 0 : index
    %24 = vector.load %arg5[%c0_12, %c0_13] : memref<64x512xbf16, #tpu.memory_space<vmem>>, vector<64x512xbf16>
    %cst = arith.constant dense<0.000000e+00> : vector<128x512xf32>
    %25 = tpu.matmul %3, %24, %cst {dimension_numbers = #tpu.dot_dimension_numbers<[0], [0], [1], [1], [0, 1, 1, 1], [], []>} : vector<64x128xbf16>, vector<64x512xbf16>, vector<128x512xf32> -> vector<128x512xf32>
    %26 = arith.addf %23, %25 : vector<128x512xf32>
    %c0_14 = arith.constant 0 : index
    %c0_15 = arith.constant 0 : index
    %c0_16 = arith.constant 0 : index
    %27 = vector.load %arg4[%c0_14, %c0_15, %c0_16] : memref<1x128x512xf32, #tpu.memory_space<vmem>>, vector<1x128x512xf32>
    %28 = vector.shape_cast %27 : vector<1x128x512xf32> to vector<128x512xf32>
    %29 = vector.shape_cast %26 : vector<128x512xf32> to vector<1x128x512xf32>
    tpu.vector_store %arg4[%c0_14, %c0_15, %c0_16], %29 {strides = array<i32>} : memref<1x128x512xf32, #tpu.memory_space<vmem>>, vector<1x128x512xf32>,
    return
  }
  func.func @transform_0(%arg0: i32, %arg1: i32) -> (i32, i32) {
    %c1_i32 = arith.constant 1 : i32
    %0 = arith.muli %arg0, %c1_i32 : i32
    %1 = arith.addi %0, %arg1 : i32
    %c0_i32 = arith.constant 0 : i32
    %c0_i32_0 = arith.constant 0 : i32
    return %1, %c0_i32 : i32, i32
  }
  func.func @transform_1(%arg0: i32, %arg1: i32) -> (i32, i32) {
    %c1_i32 = arith.constant 1 : i32
    %0 = arith.muli %arg0, %c1_i32 : i32
    %1 = arith.addi %0, %arg1 : i32
    %c0_i32 = arith.constant 0 : i32
    %c0_i32_0 = arith.constant 0 : i32
    return %1, %c0_i32 : i32, i32
  }
  func.func @transform_2(%arg0: i32, %arg1: i32) -> (i32, i32, i32) {
    %c0_i32 = arith.constant 0 : i32
    %c0_i32_0 = arith.constant 0 : i32
    %c0_i32_1 = arith.constant 0 : i32
    return %arg0, %c0_i32, %c0_i32_0 : i32, i32, i32
  }
}

</mosaic_0001>

<bundles_post_ra>
// kernel: tpu_custom_call.1
= control target key start
LH: loop header
LB: loop body
LE: loop exit
PB: predicated region body
PF: predicated region fallthrough
CT: control target
= control target key end

     0   :  { %v1228_v2 = vmov 1   ;;  %v1229_v3 = vmov 0   ;;  %s1440_s0 = inlined_call_operand.vmem [shape: bf16[64,128], index: 0, kind: input, shape index: {}]   ;;  %s1441_s1 = inlined_call_operand.vmem [shape: f32[64,4], index: 1, kind: input, shape index: {}]   ;;  %s1442_s2 = inlined_call_operand.hbm [shape: f32[1,128,512], index: 2, kind: output, shape index: {}]  }
   0x1   :  { %v133_v0 = vld [vmem:[%s1441_s1] sm:$0xff]  ;;  %v134_v1 = vld [vmem:[%s1441_s1 + $0x8] sm:$0xff]  ;;  %1186 = vset.pattern.permute.xlu0 %v1228_v2  ;;  %1187 = vset.pattern.permute.xlu1 %v1229_v3  ;;  %v135_v5 = vld [vmem:[%s1441_s1 + $0x10] sm:$0xff] }
   0x2   :  { %v141_v4 = vpack.c.bf16 %v134_v1, %v133_v0  ;;  %v136_v6 = vld [vmem:[%s1441_s1 + $0x18] sm:$0xff]  ;;  %790 = vmatprep.mubr.bf16.mxu0 %v1229_v3  ;;  %903 = vmatprep.mubr.bf16.mxu1 %v1229_v3 }
   0x3   :  { %v142_v7 = vpack.c.bf16 %v136_v6, %v135_v5 }
   0x4   :  { %147 = vperm.xlu1 %1187, %v141_v4   ;;  %266 = vperm.xlu0 %1186, %v141_v4  }
   0x5   :  { %7 = vsyncpa [#allocation4], 0  ;;  %v137_v8 = vld [vmem:[%s1441_s1 + $0x20] sm:$0xff]  ;;  %v138_v9 = vld [vmem:[%s1441_s1 + $0x28] sm:$0xff]  ;;  %v1230_v10 = vmov 2   ;;  %v1231_v12 = vmov 3   ;;  %v168_v30 = vlaneseq }
   0x6   :  { %v143_v11 = vpack.c.bf16 %v138_v9, %v137_v8  ;;  %v139_v13 = vld [vmem:[%s1441_s1 + $0x30] sm:$0xff]  ;;  %v140_v14 = vld [vmem:[%s1441_s1 + $0x38] sm:$0xff]  ;;  %v1285_v16 = vld [vmem:[%s1440_s0] sm:$0xf]  ;;  %v1232_v28 = vmov 839922192  }
   0x7   :  { %v144_v15 = vpack.c.bf16 %v140_v14, %v139_v13  ;;  %v1290_v17 = vld [vmem:[%s1440_s0 + $0x4] sm:$0xf]  ;;  %v1297_v19 = vld [vmem:[%s1440_s0 + $0x8] sm:$0xf]  ;;  %v1302_v20 = vld [vmem:[%s1440_s0 + $0xc] sm:$0xf]  ;;  %v166_v29 = vunpack.c.l.s4 %v1232_v28 }
   0x8   :  { %1188 = vset.pattern.permute.xlu1 %v1230_v10  ;;  %1191 = vset.pattern.permute.xlu0 %v1230_v10  ;;  %v1156_v18 = vcombine.low %v1285_v16, %v1290_v17  ;;  %v1157_v21 = vcombine.low %v1297_v19, %v1302_v20  ;;  %v1309_v22 = vld [vmem:[%s1440_s0 + $0x10] sm:$0xf]  ;;  %v1314_v23 = vld [vmem:[%s1440_s0 + $0x14] sm:$0xf]  ;;  %v1321_v25 = vld [vmem:[%s1440_s0 + $0x18] sm:$0xf] }
   0x9   :  { %382 = vperm.xlu1 %1188, %v141_v4   ;;  %385 = vperm.xlu0 %1191, %v142_v7   ;;  %v1158_v24 = vcombine.low %v1309_v22, %v1314_v23  ;;  %v1326_v26 = vld [vmem:[%s1440_s0 + $0x1c] sm:$0xf]  ;;  %v1233_v31 = vmov 1985246804   ;;  %v167_v33 = vunpack.c.0.s8 %v166_v29  ;;  %v169_v34 = vshrl.u32 %v168_v30, 7  ;;  %s1234_s0 = smov [#allocation3]  }
   0xa   :  { %v1159_v27 = vcombine.low %v1321_v25, %v1326_v26  ;;  %v173_v32 = vunpack.c.l.s4 %v1233_v31  ;;  %vm733_vm0 = vcmask 523264   ;;  %s1117_s12 = sshll.u32 %s1234_s0, 4  ;;  %s1118_s12 = int_to_ptr.vmem [resolvable:$true] %s1117_s12 }
   0xb   :  { %v1330_v36 = vsub.s32 %v167_v33, %v169_v34  ;;  %s1204_s13 = scalar_lea.vmem %s1118_s12, 8192  ;;  %p1209_p1 = scmp.lt.s32.totalorder %s1118_s12, %s1118_s12 }
   0xc   :  { %v174_v35 = vunpack.c.0.s8 %v173_v32  ;;  %p1205_p0 = scmp.ne.s32.totalorder %s1118_s12, %s1204_s13  ;;  %p1210_p2 = scmp.lt.s32.totalorder %s1204_s13, %s1204_s13 }
   0xd   :  { %1189 = vset.pattern.permute.xlu1 %v1228_v2  ;;  %1194 = vset.pattern.permute.xlu0 %v1229_v3 }
   0xe   :  { %269 = vperm.xlu1 %1189, %v142_v7   ;;  %155 = vperm.xlu0 %1194, %v143_v11   ;;  %v1332_v37 = vsub.s32 %v174_v35, %v169_v34  ;;  %p1211_p3 = por %p1210_p2, %p1209_p1 }
  0x10   :  { %p1212_p4 = pnand %p1211_p3, %p1205_p0 }
  0x12   :  { %1190 = vset.pattern.permute.xlu1 %v1229_v3  ;;  %1195 = vset.pattern.permute.xlu0 %v1231_v12 }
  0x13   :  { %151 = vperm.xlu1 %1190, %v142_v7   ;;  %498 = vperm.xlu0 %1195, %v141_v4  }
  0x17   :  { %1192 = vset.pattern.permute.xlu1 %v1228_v2  ;;  %501 = vperm.xlu0 %1195, %v142_v7  }
  0x18   :  { %272 = vperm.xlu1 %1192, %v143_v11  }
  0x1b   :  { %507 = vperm.xlu0 %1195, %v144_v15  }
  0x1c   :  { %1193 = vset.pattern.permute.xlu1 %v1231_v12 }
  0x1d   :  { %504 = vperm.xlu1 %1193, %v143_v11  }
  0x21   :  { %1196 = vset.pattern.permute.xlu1 %v1230_v10 }
  0x22   :  { %388 = vperm.xlu1 %1196, %v143_v11  }
  0x26   :  { %1197 = vset.pattern.permute.xlu1 %v1228_v2 }
  0x27   :  { %275 = vperm.xlu1 %1197, %v144_v15  }
  0x2b   :  { %1198 = vset.pattern.permute.xlu1 %v1229_v3 }
  0x2c   :  { %159 = vperm.xlu1 %1198, %v144_v15  }
  0x30   :  { %1199 = vset.pattern.permute.xlu1 %v1230_v10 }
  0x31   :  { %391 = vperm.xlu1 %1199, %v144_v15  }
  0x39   :  { %717 = vxpose.xlu0.c.b16.start [1/4] (short) %v1156_v18, 128 }
  0x3d   :  { %718 = vxpose.xlu0.c.b16.cont [2/4] (short) %v1157_v21, 128 }
  0x41   :  { %719 = vxpose.xlu0.c.b16.cont [3/4] (short) %v1158_v24, 128 }
  0x45   :  { %720 = vxpose.xlu0.c.b16.end [4/4] (short) %v1159_v27, 128 }
  0x83   :  { %v148_v38 = vpop.permute.xlu1 %147  ;;  %v267_v39 = vpop.permute.xlu0 %266 }
  0x84   :  { %v171_v40 = vrot.slane %v148_v38, %v1330_v36  ;;  %v178_v41 = vrot.slane %v148_v38, %v1332_v37  ;;  %v287_v42 = vrot.slane %v267_v39, %v1330_v36  ;;  %v294_v43 = vrot.slane %v267_v39, %v1332_v37 }
  0x86   :  { %v345_v44 = vmul.bf16 %v287_v42, %v1285_v16  ;;  %v346_v45 = vmul.bf16 %v294_v43, %v1290_v17  ;;  %v229_v46 = vmul.bf16 %v171_v40, %v1285_v16  ;;  %v230_v47 = vmul.bf16 %v178_v41, %v1290_v17 }
  0x88   :  { %v383_v48 = vpop.permute.xlu1 %382  ;;  %v386_v49 = vpop.permute.xlu0 %385  ;;  %v1144_v50 = vcombine.low %v345_v44, %v346_v45  ;;  %v1140_v51 = vcombine.low %v229_v46, %v230_v47 }
  0x89   :  { %v403_v56 = vrot.slane %v383_v48, %v1330_v36  ;;  %v410_v57 = vrot.slane %v383_v48, %v1332_v37  ;;  %v417_v60 = vrot.slane %v386_v49, %v1330_v36  ;;  %v424_v61 = vrot.slane %v386_v49, %v1332_v37 }
  0x8a   :  { %758 = vmatprep.subr.bf16.mxu0 %v1144_v50 }
  0x8b   :  { %759 = vmatpush1.bf16.msra.mxu0 %v1140_v51  ;;  %v461_v8 = vmul.bf16 %v403_v56, %v1285_v16  ;;  %v462_v9 = vmul.bf16 %v410_v57, %v1290_v17  ;;  %v463_v14 = vmul.bf16 %v417_v60, %v1297_v19  ;;  %v464_v15 = vmul.bf16 %v424_v61, %v1302_v20 }
  0x8d   :  { %v270_v52 = vpop.permute.xlu1 %269  ;;  %v156_v53 = vpop.permute.xlu0 %155  ;;  %v1148_v32 = vcombine.low %v461_v8, %v462_v9  ;;  %v1149_v39 = vcombine.low %v463_v14, %v464_v15 }
  0x8e   :  { %v301_v54 = vrot.slane %v270_v52, %v1330_v36  ;;  %v308_v55 = vrot.slane %v270_v52, %v1332_v37  ;;  %v199_v62 = vrot.slane %v156_v53, %v1330_v36  ;;  %v206_v63 = vrot.slane %v156_v53, %v1332_v37 }
  0x90   :  { %v347_v58 = vmul.bf16 %v301_v54, %v1297_v19  ;;  %v348_v59 = vmul.bf16 %v308_v55, %v1302_v20  ;;  %v233_v18 = vmul.bf16 %v199_v62, %v1309_v22  ;;  %v234_v21 = vmul.bf16 %v206_v63, %v1314_v23 }
  0x92   :  { %v152_v0 = vpop.permute.xlu1 %151  ;;  %v499_v1 = vpop.permute.xlu0 %498  ;;  %v1145_v2 = vcombine.low %v347_v58, %v348_v59  ;;  %v1142_v42 = vcombine.low %v233_v18, %v234_v21 }
  0x93   :  { %v185_v4 = vrot.slane %v152_v0, %v1330_v36  ;;  %v192_v5 = vrot.slane %v152_v0, %v1332_v37  ;;  %v519_v6 = vrot.slane %v499_v1, %v1330_v36  ;;  %v526_v7 = vrot.slane %v499_v1, %v1332_v37 }
  0x94   :  { %760 = vmatprep.subr.bf16.mxu0 %v1145_v2 }
  0x95   :  { %v231_v10 = vmul.bf16 %v185_v4, %v1297_v19  ;;  %v232_v11 = vmul.bf16 %v192_v5, %v1302_v20  ;;  %v577_v12 = vmul.bf16 %v519_v6, %v1285_v16  ;;  %v578_v13 = vmul.bf16 %v526_v7, %v1290_v17 }
  0x96   :  { %v502_v24 = vpop.permute.xlu0 %501 }
  0x97   :  { %v273_v27 = vpop.permute.xlu1 %272  ;;  %v533_v28 = vrot.slane %v502_v24, %v1330_v36  ;;  %v540_v29 = vrot.slane %v502_v24, %v1332_v37  ;;  %v1141_v30 = vcombine.low %v231_v10, %v232_v11  ;;  %v1152_v31 = vcombine.low %v577_v12, %v578_v13 }
  0x98   :  { %v315_v16 = vrot.slane %v273_v27, %v1330_v36  ;;  %v322_v17 = vrot.slane %v273_v27, %v1332_v37 }
  0x99   :  { %v579_v33 = vmul.bf16 %v533_v28, %v1297_v19  ;;  %v580_v34 = vmul.bf16 %v540_v29, %v1302_v20  ;;  %761 = vmatpush1.bf16.msra.mxu0 %v1141_v30  ;;  %871 = vmatprep.subr.bf16.mxu1 %v1152_v31 }
  0x9a   :  { %v349_v35 = vmul.bf16 %v315_v16, %v1309_v22  ;;  %v350_v38 = vmul.bf16 %v322_v17, %v1314_v23  ;;  %872 = vmatpush1.bf16.msra.mxu1 %v1148_v32  ;;  %v508_v40 = vpop.permute.xlu0 %507 }
  0x9b   :  { %v1153_v41 = vcombine.low %v579_v33, %v580_v34  ;;  %v561_v19 = vrot.slane %v508_v40, %v1330_v36  ;;  %v568_v20 = vrot.slane %v508_v40, %v1332_v37 }
  0x9c   :  { %v505_v43 = vpop.permute.xlu1 %504  ;;  %v1146_v44 = vcombine.low %v349_v35, %v350_v38 }
  0x9d   :  { %v547_v45 = vrot.slane %v505_v43, %v1330_v36  ;;  %v554_v46 = vrot.slane %v505_v43, %v1332_v37  ;;  %873 = vmatprep.subr.bf16.mxu1 %v1153_v41  ;;  %v583_v50 = vmul.bf16 %v561_v19, %v1321_v25  ;;  %v584_v51 = vmul.bf16 %v568_v20, %v1326_v26 }
  0x9e   :  { %762 = vmatprep.subr.bf16.mxu0 %v1146_v44  ;;  %874 = vmatpush1.bf16.msra.mxu1 %v1149_v39 }
  0x9f   :  { %v581_v47 = vmul.bf16 %v547_v45, %v1309_v22  ;;  %v582_v48 = vmul.bf16 %v554_v46, %v1314_v23  ;;  %763 = vmatpush1.bf16.msra.mxu0 %v1142_v42  ;;  %v1155_v57 = vcombine.low %v583_v50, %v584_v51  ;;  %v725_v9 = vpop.trf.xlu0 }
  0xa1   :  { %v389_v49 = vpop.permute.xlu1 %388  ;;  %v1154_v52 = vcombine.low %v581_v47, %v582_v48 }
  0xa2   :  { %v431_v53 = vrot.slane %v389_v49, %v1330_v36  ;;  %v438_v54 = vrot.slane %v389_v49, %v1332_v37 }
  0xa3   :  { %875 = vmatprep.subr.bf16.mxu1 %v1154_v52  ;;  %v726_v13 = vpop.trf.xlu0 }
  0xa4   :  { %v465_v55 = vmul.bf16 %v431_v53, %v1309_v22  ;;  %v466_v56 = vmul.bf16 %v438_v54, %v1314_v23 }
  0xa6   :  { %v276_v58 = vpop.permute.xlu1 %275  ;;  %v1150_v59 = vcombine.low %v465_v55, %v466_v56 }
  0xa7   :  { %v329_v60 = vrot.slane %v276_v58, %v1330_v36  ;;  %v336_v61 = vrot.slane %v276_v58, %v1332_v37 }
  0xa8   :  { %876 = vmatpush1.bf16.msra.mxu1 %v1150_v59 }
  0xa9   :  { %v351_v62 = vmul.bf16 %v329_v60, %v1321_v25  ;;  %v352_v63 = vmul.bf16 %v336_v61, %v1326_v26  ;;  %877 = vmatprep.subr.bf16.mxu1 %v1155_v57 }
  0xab   :  { %v160_v0 = vpop.permute.xlu1 %159  ;;  %v1147_v1 = vcombine.low %v351_v62, %v352_v63 }
  0xac   :  { %v213_v2 = vrot.slane %v160_v0, %v1330_v36  ;;  %v220_v22 = vrot.slane %v160_v0, %v1332_v37 }
  0xad   :  { %764 = vmatprep.subr.bf16.mxu0 %v1147_v1 }
  0xae   :  { %v235_v23 = vmul.bf16 %v213_v2, %v1321_v25  ;;  %v236_v4 = vmul.bf16 %v220_v22, %v1326_v26 }
  0xb0   :  { %v392_v5 = vpop.permute.xlu1 %391  ;;  %v1143_v6 = vcombine.low %v235_v23, %v236_v4 }
  0xb1   :  { %v445_v7 = vrot.slane %v392_v5, %v1330_v36  ;;  %v452_v8 = vrot.slane %v392_v5, %v1332_v37 }
  0xb2   :  { %765 = vmatpush1.bf16.msra.mxu0 %v1143_v6 }
  0xb3   :  { %v467_v10 = vmul.bf16 %v445_v7, %v1321_v25  ;;  %v468_v11 = vmul.bf16 %v452_v8, %v1326_v26  ;;  %v727_v25 = vpop.trf.xlu0 }
  0xb5   :  { %1160 = vmatmul.mubr.msk.bf16.vlgmr.msra.gmra.mrb[0].mxu0 %vm733_vm0, %v725_v9  ;;  %v1151_v12 = vcombine.low %v467_v10, %v468_v11 }
  0xb6   :  { %800 = vmatprep.mubr.bf16.mxu0 %v1229_v3 }
  0xb7   :  { %878 = vmatpush1.bf16.msra.mxu1 %v1151_v12  ;;  %v728_v26 = vpop.trf.xlu0 }
  0xba   :  { %1168 = vmatmul.mubr.msk.bf16.vlgmr.msra.gmra.mrb[0].mxu1 %vm733_vm0, %v725_v9 }
  0xbb   :  { %913 = vmatprep.mubr.bf16.mxu1 %v1229_v3  ;;  %v729_v36 = vpop.trf.xlu0 }
  0xbd   :  { %1161 = vmatmul.mubr.msk.bf16.gmra.mrb[4].mxu0 %vm733_vm0, %v726_v13 }
  0xbe   :  { %810 = vmatprep.mubr.bf16.mxu0 %v1229_v3 }
  0xbf   :  { %v730_v37 = vpop.trf.xlu0 }
  0xc2   :  { %1169 = vmatmul.mubr.msk.bf16.gmra.mrb[4].mxu1 %vm733_vm0, %v726_v13 }
  0xc3   :  { %923 = vmatprep.mubr.bf16.mxu1 %v1229_v3  ;;  %v731_v14 = vpop.trf.xlu0 }
  0xc5   :  { %1162 = vmatmul.mubr.msk.bf16.gmra.mrb[8].mxu0 %vm733_vm0, %v727_v25 }
  0xc6   :  { %820 = vmatprep.mubr.bf16.mxu0 %v1229_v3 }
  0xc7   :  { %v732_v15 = vpop.trf.xlu0 }
  0xca   :  { %1170 = vmatmul.mubr.msk.bf16.gmra.mrb[8].mxu1 %vm733_vm0, %v727_v25 }
  0xcb   :  { %933 = vmatprep.mubr.bf16.mxu1 %v1229_v3 }
  0xcd   :  { %1163 = vmatmul.mubr.msk.bf16.gmra.mrb[12].mxu0 %vm733_vm0, %v728_v26 }
  0xce   :  { %830 = vmatprep.mubr.bf16.mxu0 %v1229_v3 }
  0xd2   :  { %1171 = vmatmul.mubr.msk.bf16.gmra.mrb[12].mxu1 %vm733_vm0, %v728_v26 }
  0xd3   :  { %943 = vmatprep.mubr.bf16.mxu1 %v1229_v3 }
  0xd5   :  { %1164 = vmatmul.mubr.msk.bf16.gmra.mrb[16].mxu0 %vm733_vm0, %v729_v36 }
  0xd6   :  { %840 = vmatprep.mubr.bf16.mxu0 %v1229_v3 }
  0xda   :  { %1172 = vmatmul.mubr.msk.bf16.gmra.mrb[16].mxu1 %vm733_vm0, %v729_v36 }
  0xdb   :  { %953 = vmatprep.mubr.bf16.mxu1 %v1229_v3 }
  0xdd   :  { %1165 = vmatmul.mubr.msk.bf16.gmra.mrb[20].mxu0 %vm733_vm0, %v730_v37 }
  0xde   :  { %850 = vmatprep.mubr.bf16.mxu0 %v1229_v3 }
  0xe2   :  { %1173 = vmatmul.mubr.msk.bf16.gmra.mrb[20].mxu1 %vm733_vm0, %v730_v37 }
  0xe3   :  { %963 = vmatprep.mubr.bf16.mxu1 %v1229_v3 }
  0xe5   :  { %1166 = vmatmul.mubr.msk.bf16.gmra.mrb[24].mxu0 %vm733_vm0, %v731_v14 }
  0xe6   :  { %860 = vmatprep.mubr.bf16.mxu0 %v1229_v3 }
  0xea   :  { %1174 = vmatmul.mubr.msk.bf16.gmra.mrb[24].mxu1 %vm733_vm0, %v731_v14 }
  0xeb   :  { %973 = vmatprep.mubr.bf16.mxu1 %v1229_v3 }
  0xed   :  { %1167 = vmatmul.mubr.msk.bf16.gmra.mrb[28].mxu0 %vm733_vm0, %v732_v15 }
  0xf2   :  { %1175 = vmatmul.mubr.msk.bf16.gmra.mrb[28].mxu1 %vm733_vm0, %v732_v15 }
 0x188   :  { %v792_v18 = vpop.f32.mrb[0].mxu0 }
 0x189   :  { %v794_v21 = vpop.f32.mrb[1].mxu0  ;;  %1048 = vst [vmem:[#allocation3] sm:$0xff] %v792_v18 }
 0x18a   :  { %v796_v24 = vpop.f32.mrb[2].mxu0  ;;  %1049 = vst [vmem:[#allocation3 + $0x8] sm:$0xff] %v794_v21 }
 0x18b   :  { %v798_v27 = vpop.f32.mrb[3].mxu0  ;;  %1052 = vst [vmem:[#allocation3 + $0x20] sm:$0xff] %v796_v24 }
 0x18c   :  { %1053 = vst [vmem:[#allocation3 + $0x28] sm:$0xff] %v798_v27 }
 0x18d   :  { %v905_v28 = vpop.f32.mrb[0].mxu1 }
 0x18e   :  { %v907_v29 = vpop.f32.mrb[1].mxu1  ;;  %1050 = vst [vmem:[#allocation3 + $0x10] sm:$0xff] %v905_v28 }
 0x18f   :  { %v909_v30 = vpop.f32.mrb[2].mxu1  ;;  %1051 = vst [vmem:[#allocation3 + $0x18] sm:$0xff] %v907_v29 }
 0x190   :  { %v911_v31 = vpop.f32.mrb[3].mxu1  ;;  %v802_v16 = vpop.f32.mrb[4].mxu0  ;;  %1054 = vst [vmem:[#allocation3 + $0x30] sm:$0xff] %v909_v30 }
 0x191   :  { %v804_v3 = vpop.f32.mrb[5].mxu0  ;;  %1055 = vst [vmem:[#allocation3 + $0x38] sm:$0xff] %v911_v31  ;;  %1056 = vst [vmem:[#allocation3 + $0x40] sm:$0xff] %v802_v16 }
 0x192   :  { %v806_v17 = vpop.f32.mrb[6].mxu0  ;;  %1057 = vst [vmem:[#allocation3 + $0x48] sm:$0xff] %v804_v3 }
 0x193   :  { %v808_v32 = vpop.f32.mrb[7].mxu0  ;;  %1060 = vst [vmem:[#allocation3 + $0x60] sm:$0xff] %v806_v17 }
 0x194   :  { %1061 = vst [vmem:[#allocation3 + $0x68] sm:$0xff] %v808_v32 }
 0x195   :  { %v915_v33 = vpop.f32.mrb[4].mxu1 }
 0x196   :  { %v917_v34 = vpop.f32.mrb[5].mxu1  ;;  %1058 = vst [vmem:[#allocation3 + $0x50] sm:$0xff] %v915_v33 }
 0x197   :  { %v919_v35 = vpop.f32.mrb[6].mxu1  ;;  %1059 = vst [vmem:[#allocation3 + $0x58] sm:$0xff] %v917_v34 }
 0x198   :  { %v921_v38 = vpop.f32.mrb[7].mxu1  ;;  %v812_v39 = vpop.f32.mrb[8].mxu0  ;;  %1062 = vst [vmem:[#allocation3 + $0x70] sm:$0xff] %v919_v35 }
 0x199   :  { %v814_v40 = vpop.f32.mrb[9].mxu0  ;;  %1063 = vst [vmem:[#allocation3 + $0x78] sm:$0xff] %v921_v38  ;;  %1064 = vst [vmem:[#allocation3 + $0x80] sm:$0xff] %v812_v39 }
 0x19a   :  { %v816_v41 = vpop.f32.mrb[10].mxu0  ;;  %1065 = vst [vmem:[#allocation3 + $0x88] sm:$0xff] %v814_v40 }
 0x19b   :  { %v818_v42 = vpop.f32.mrb[11].mxu0  ;;  %1068 = vst [vmem:[#allocation3 + $0xa0] sm:$0xff] %v816_v41 }
 0x19c   :  { %1069 = vst [vmem:[#allocation3 + $0xa8] sm:$0xff] %v818_v42 }
 0x19d   :  { %v925_v43 = vpop.f32.mrb[8].mxu1 }
 0x19e   :  { %v927_v44 = vpop.f32.mrb[9].mxu1  ;;  %1066 = vst [vmem:[#allocation3 + $0x90] sm:$0xff] %v925_v43 }
 0x19f   :  { %v929_v45 = vpop.f32.mrb[10].mxu1  ;;  %1067 = vst [vmem:[#allocation3 + $0x98] sm:$0xff] %v927_v44 }
 0x1a0   :  { %v931_v46 = vpop.f32.mrb[11].mxu1  ;;  %v822_v19 = vpop.f32.mrb[12].mxu0  ;;  %1070 = vst [vmem:[#allocation3 + $0xb0] sm:$0xff] %v929_v45 }
 0x1a1   :  { %v824_v20 = vpop.f32.mrb[13].mxu0  ;;  %1071 = vst [vmem:[#allocation3 + $0xb8] sm:$0xff] %v931_v46  ;;  %1072 = vst [vmem:[#allocation3 + $0xc0] sm:$0xff] %v822_v19 }
 0x1a2   :  { %v826_v47 = vpop.f32.mrb[14].mxu0  ;;  %1073 = vst [vmem:[#allocation3 + $0xc8] sm:$0xff] %v824_v20 }
 0x1a3   :  { %v828_v48 = vpop.f32.mrb[15].mxu0  ;;  %1076 = vst [vmem:[#allocation3 + $0xe0] sm:$0xff] %v826_v47 }
 0x1a4   :  { %1077 = vst [vmem:[#allocation3 + $0xe8] sm:$0xff] %v828_v48 }
 0x1a5   :  { %v935_v49 = vpop.f32.mrb[12].mxu1 }
 0x1a6   :  { %v937_v50 = vpop.f32.mrb[13].mxu1  ;;  %1074 = vst [vmem:[#allocation3 + $0xd0] sm:$0xff] %v935_v49 }
 0x1a7   :  { %v939_v51 = vpop.f32.mrb[14].mxu1  ;;  %1075 = vst [vmem:[#allocation3 + $0xd8] sm:$0xff] %v937_v50 }
 0x1a8   :  { %v941_v52 = vpop.f32.mrb[15].mxu1  ;;  %v832_v53 = vpop.f32.mrb[16].mxu0  ;;  %1078 = vst [vmem:[#allocation3 + $0xf0] sm:$0xff] %v939_v51 }
 0x1a9   :  { %v834_v54 = vpop.f32.mrb[17].mxu0  ;;  %1079 = vst [vmem:[#allocation3 + $0xf8] sm:$0xff] %v941_v52  ;;  %1080 = vst [vmem:[#allocation3 + $0x100] sm:$0xff] %v832_v53 }
 0x1aa   :  { %v836_v55 = vpop.f32.mrb[18].mxu0  ;;  %1081 = vst [vmem:[#allocation3 + $0x108] sm:$0xff] %v834_v54 }
 0x1ab   :  { %v838_v56 = vpop.f32.mrb[19].mxu0  ;;  %1084 = vst [vmem:[#allocation3 + $0x120] sm:$0xff] %v836_v55 }
 0x1ac   :  { %1085 = vst [vmem:[#allocation3 + $0x128] sm:$0xff] %v838_v56 }
 0x1ad   :  { %v945_v57 = vpop.f32.mrb[16].mxu1 }
 0x1ae   :  { %v947_v58 = vpop.f32.mrb[17].mxu1  ;;  %1082 = vst [vmem:[#allocation3 + $0x110] sm:$0xff] %v945_v57 }
 0x1af   :  { %v949_v59 = vpop.f32.mrb[18].mxu1  ;;  %1083 = vst [vmem:[#allocation3 + $0x118] sm:$0xff] %v947_v58 }
 0x1b0   :  { %v951_v60 = vpop.f32.mrb[19].mxu1  ;;  %v842_v61 = vpop.f32.mrb[20].mxu0  ;;  %1086 = vst [vmem:[#allocation3 + $0x130] sm:$0xff] %v949_v59 }
 0x1b1   :  { %v844_v62 = vpop.f32.mrb[21].mxu0  ;;  %1087 = vst [vmem:[#allocation3 + $0x138] sm:$0xff] %v951_v60  ;;  %1088 = vst [vmem:[#allocation3 + $0x140] sm:$0xff] %v842_v61 }
 0x1b2   :  { %v846_v63 = vpop.f32.mrb[22].mxu0  ;;  %1089 = vst [vmem:[#allocation3 + $0x148] sm:$0xff] %v844_v62 }
 0x1b3   :  { %v848_v0 = vpop.f32.mrb[23].mxu0  ;;  %1092 = vst [vmem:[#allocation3 + $0x160] sm:$0xff] %v846_v63 }
 0x1b4   :  { %1093 = vst [vmem:[#allocation3 + $0x168] sm:$0xff] %v848_v0 }
 0x1b5   :  { %v955_v1 = vpop.f32.mrb[20].mxu1 }
 0x1b6   :  { %v957_v2 = vpop.f32.mrb[21].mxu1  ;;  %1090 = vst [vmem:[#allocation3 + $0x150] sm:$0xff] %v955_v1 }
 0x1b7   :  { %v959_v22 = vpop.f32.mrb[22].mxu1  ;;  %1091 = vst [vmem:[#allocation3 + $0x158] sm:$0xff] %v957_v2 }
 0x1b8   :  { %v961_v23 = vpop.f32.mrb[23].mxu1  ;;  %v852_v4 = vpop.f32.mrb[24].mxu0  ;;  %1094 = vst [vmem:[#allocation3 + $0x170] sm:$0xff] %v959_v22 }
 0x1b9   :  { %v854_v5 = vpop.f32.mrb[25].mxu0  ;;  %1095 = vst [vmem:[#allocation3 + $0x178] sm:$0xff] %v961_v23  ;;  %1096 = vst [vmem:[#allocation3 + $0x180] sm:$0xff] %v852_v4 }
 0x1ba   :  { %v856_v6 = vpop.f32.mrb[26].mxu0  ;;  %1097 = vst [vmem:[#allocation3 + $0x188] sm:$0xff] %v854_v5 }
 0x1bb   :  { %v858_v7 = vpop.f32.mrb[27].mxu0  ;;  %1100 = vst [vmem:[#allocation3 + $0x1a0] sm:$0xff] %v856_v6 }
 0x1bc   :  { %1101 = vst [vmem:[#allocation3 + $0x1a8] sm:$0xff] %v858_v7 }
 0x1bd   :  { %v965_v8 = vpop.f32.mrb[24].mxu1 }
 0x1be   :  { %v967_v9 = vpop.f32.mrb[25].mxu1  ;;  %1098 = vst [vmem:[#allocation3 + $0x190] sm:$0xff] %v965_v8 }
 0x1bf   :  { %v969_v10 = vpop.f32.mrb[26].mxu1  ;;  %1099 = vst [vmem:[#allocation3 + $0x198] sm:$0xff] %v967_v9 }
 0x1c0   :  { %v971_v11 = vpop.f32.mrb[27].mxu1  ;;  %v862_v12 = vpop.f32.mrb[28].mxu0  ;;  %1102 = vst [vmem:[#allocation3 + $0x1b0] sm:$0xff] %v969_v10 }
 0x1c1   :  { %v864_v13 = vpop.f32.mrb[29].mxu0  ;;  %1103 = vst [vmem:[#allocation3 + $0x1b8] sm:$0xff] %v971_v11  ;;  %1104 = vst [vmem:[#allocation3 + $0x1c0] sm:$0xff] %v862_v12 }
 0x1c2   :  { %v866_v25 = vpop.f32.mrb[30].mxu0  ;;  %1105 = vst [vmem:[#allocation3 + $0x1c8] sm:$0xff] %v864_v13 }
 0x1c3   :  { %v868_v26 = vpop.f32.mrb[31].mxu0  ;;  %1108 = vst [vmem:[#allocation3 + $0x1e0] sm:$0xff] %v866_v25 }
 0x1c4   :  { %1109 = vst [vmem:[#allocation3 + $0x1e8] sm:$0xff] %v868_v26 }
 0x1c5   :  { %v975_v36 = vpop.f32.mrb[28].mxu1 }
 0x1c6   :  { %v977_v37 = vpop.f32.mrb[29].mxu1  ;;  %1106 = vst [vmem:[#allocation3 + $0x1d0] sm:$0xff] %v975_v36 }
 0x1c7   :  { %v979_v14 = vpop.f32.mrb[30].mxu1  ;;  %1107 = vst [vmem:[#allocation3 + $0x1d8] sm:$0xff] %v977_v37 }
 0x1c8   :  { %v981_v15 = vpop.f32.mrb[31].mxu1  ;;  %1110 = vst [vmem:[#allocation3 + $0x1f0] sm:$0xff] %v979_v14 }
 0x1c9   :  { %1111 = vst [vmem:[#allocation3 + $0x1f8] sm:$0xff] %v981_v15 }
 0x1ca   :  { %1215 = shalt.err (!%p1212_p4)
}
 0x1cb   :  { %s1216_s16 = scalar_lea.hbm %s1442_s2, 8192 }
 0x1cc   :  { %p1217_p5 = scmp.ne.s32.totalorder %s1442_s2, %s1216_s16  ;;  %p1220_p6 = scmp.lt.u32.totalorder %s1216_s16, %s1442_s2 }
 0x1ce   :  { %p1222_p7 = pnand %p1220_p6, %p1217_p5 }
 0x1d0   :  { %1225 = shalt.err (!%p1222_p7)
}
 0x1d1   :  { %s1235_s21 = smov 512   ;;  %s1236_s22 = smov 32  }
 0x1d2   :  { %1123 = dma.vmem_to_hbm [thread:$0]  %s1118_s12, 8192, %s1442_s2, [#allocation4], %s1235_s21, %s1235_s21, %s1236_s22  }
 0x1d3   :  { %1226 = dma.done.wait [#allocation4], 8192  }
 0x1d4   :  { %1227 = vsyncadd [#allocation4], 4294959104 }
 0x1d5   :  { %1127 = vsyncpa [#allocation4], 1 }

</bundles_post_ra>
